<compile_context>
chip_gen: v7x
topology: tpu7x:2x2x1
jax: 0.10.0
libtpu: 0.0.40
codegen_flags: <defaults>
</compile_context>

<pallas_src>
import functools

import jax
import jax.numpy as jnp
from jax import lax
from jax.experimental import pallas as pl
from jax.experimental.pallas import tpu as pltpu


def _cdiv(a, b):
    return -(-a // b)


def _iou_counts_kernel(logits_ref, target_ref, counts_ref, *,
                       num_classes, r_tile, chunk, n_full, tail,
                       n_inner, total_pixels, loop_unroll):
    """One (batch image, super-chunk, inner pixel tile) grid step.

    logits_ref: (1, C, r_tile, 128) native dtype — per-class dense pixel slabs.
    target_ref: (1, r_tile, 128) int32.
    counts_ref: (1, 1, 3*C, 128) f32 lane-partial accumulator, resident across
                the inner ("arbitrary") tile axis. Row layout k*C + c:
                  k=0: |pred==c & target==c|, k=1: |pred==c|, k=2: |target==c|.

    Ragged tiles (last tile of the image / non-lane-aligned pixel counts) are
    handled by a global pixel-index validity mask, so out-of-bounds rows of a
    partial edge block may hold garbage without affecting the counts.
    """
    C = num_classes
    f32 = jnp.float32
    i = pl.program_id(2)

    @pl.when(i == 0)
    def _init():
        counts_ref[...] = jnp.zeros_like(counts_ref)

    tile_idx = pl.program_id(1) * n_inner + i
    tile_pix0 = tile_idx * (r_tile * 128)

    def class_masks(row0, nrows, pix0, local_pix):
        # Pixel validity (ragged last tile / lane padding).
        valid = (local_pix + pix0) < total_pixels
        tgt = jnp.where(valid, target_ref[0, pl.ds(row0, nrows), :], C)

        # Running argmax over the class axis, first-max tie-break
        # (torch.argmax).  Softmax dropped: monotone => argmax-invariant.
        # Comparisons stay in the logits' native dtype (bf16 stays bf16).
        # NOTE: for very large num_classes this static unroll should become a
        # lax.fori_loop with modest unroll; fine for typical segmentation C.
        best = logits_ref[0, 0, pl.ds(row0, nrows), :]
        pred = jnp.zeros((nrows, 128), jnp.int32)
        for c in range(1, C):
            v = logits_ref[0, c, pl.ds(row0, nrows), :]
            upd = v > best
            best = jnp.where(upd, v, best)
            pred = jnp.where(upd, c, pred)
        pred = jnp.where(valid, pred, C)     # invalid pixels never counted

        pm_b = [pred == c for c in range(C)]
        tm_b = [tgt == c for c in range(C)]
        im = jnp.stack([jnp.logical_and(pm_b[c], tm_b[c]).astype(f32)
                        for c in range(C)])
        pm = jnp.stack([b.astype(f32) for b in pm_b])
        tm = jnp.stack([b.astype(f32) for b in tm_b])
        return im, pm, tm                    # each (C, nrows, 128)

    # Hoisted, loop-invariant local pixel offsets of one full chunk.
    local_chunk = (lax.broadcasted_iota(jnp.int32, (chunk, 128), 0) * 128
                   + lax.broadcasted_iota(jnp.int32, (chunk, 128), 1))

    def chunk_body(j, carry):
        acc_i, acc_p, acc_t = carry
        row0 = pl.multiple_of(j * chunk, chunk)
        im, pm, tm = class_masks(row0, chunk,
                                 tile_pix0 + j * (chunk * 128), local_chunk)
        return acc_i + im, acc_p + pm, acc_t + tm

    zeros = jnp.zeros((C, chunk, 128), f32)
    acc_i, acc_p, acc_t = lax.fori_loop(
        0, n_full, chunk_body, (zeros, zeros, zeros), unroll=loop_unroll)

    part_i = jnp.sum(acc_i, axis=1)          # (C, 128) lane partials
    part_p = jnp.sum(acc_p, axis=1)
    part_t = jnp.sum(acc_t, axis=1)

    if tail > 0:   # static: single-tile image whose row count % chunk != 0
        row0 = n_full * chunk
        local_tail = (lax.broadcasted_iota(jnp.int32, (tail, 128), 0) * 128
                      + lax.broadcasted_iota(jnp.int32, (tail, 128), 1))
        im, pm, tm = class_masks(row0, tail, tile_pix0 + row0 * 128, local_tail)
        part_i = part_i + jnp.sum(im, axis=1)
        part_p = part_p + jnp.sum(pm, axis=1)
        part_t = part_t + jnp.sum(tm, axis=1)

    tile_counts = jnp.concatenate([part_i, part_p, part_t], axis=0)  # (3C,128)
    counts_ref[0, 0, :, :] = counts_ref[0, 0, :, :] + tile_counts


def iou_loss(logits, target, *, num_classes, average="macro", weight=None):
    """Pallas implementation of IOULoss.forward(logits, target)."""
    N, C, H, W = logits.shape
    assert C == num_classes
    P = H * W
    r = _cdiv(P, 128)                        # 128-pixel rows of the image
    p128 = r * 128

    # Flatten spatial dims; keep logits in native dtype over HBM.
    logits_r = logits.reshape(N, C, P)
    target_r = target.reshape(N, P).astype(jnp.int32)   # no int64 vectors on TPU
    if p128 != P:
        # Rare: H*W not lane-aligned.  Pad so the pixel axis can be viewed as
        # (rows, 128); padded pixels are masked in-kernel by the global
        # pixel-index test, so the pad values are irrelevant.
        # TODO(synk): avoid this full-copy pad via an in-kernel flat-index gather.
        logits_r = jnp.pad(logits_r, ((0, 0), (0, 0), (0, p128 - P)))
        target_r = jnp.pad(target_r, ((0, 0), (0, p128 - P)))
    logits_r = logits_r.reshape(N, C, r, 128)
    target_r = target_r.reshape(N, r, 128)

    # ---- tile sizing ---------------------------------------------------------
    itemsize = jnp.dtype(logits.dtype).itemsize
    row_bytes = C * 128 * itemsize + 128 * 4          # logits + target per row
    # Per double-buffer slot budget (covers both inputs).  2 slots + the tiny
    # counts block stay well under a 32 MiB scoped-VMEM limit, which is safe
    # on v5e/v6e (128 MiB physical) and v7x (64 MiB physical per TC).
    budget = 12 * 1024 * 1024
    cap_rows = max(8, min(512, (budget // row_bytes) // 8 * 8))
    if r <= cap_rows:
        r_tile, n_tiles = r, 1                        # full-extent single tile
    else:
        n_tiles = _cdiv(r, cap_rows)
        r_tile = _cdiv(_cdiv(r, n_tiles), 8) * 8      # balanced, multiple of 8
    # Split the tile axis so both v7x TensorCores get work even at batch 1.
    if n_tiles >= 2 and n_tiles % 2 == 0:
        n_super, n_inner = 2, n_tiles // 2
    else:
        n_super, n_inner = 1, n_tiles

    chunk = min(8, r_tile)                            # rows per vreg-resident chunk
    n_full = r_tile // chunk
    tail = r_tile - n_full * chunk
    loop_unroll = 4 if n_full % 4 == 0 else (2 if n_full % 2 == 0 else 1)

    kernel = functools.partial(
        _iou_counts_kernel,
        num_classes=num_classes, r_tile=r_tile, chunk=chunk, n_full=n_full,
        tail=tail, n_inner=n_inner, total_pixels=P, loop_unroll=loop_unroll)

    counts = pl.pallas_call(
        kernel,
        out_shape=jax.ShapeDtypeStruct((N, n_super, 3 * num_classes, 128),
                                       jnp.float32),
        grid=(N, n_super, n_inner),
        in_specs=[
            pl.BlockSpec((1, C, r_tile, 128),
                         lambda n, s, i: (n, 0, s * n_inner + i, 0)),
            pl.BlockSpec((1, r_tile, 128),
                         lambda n, s, i: (n, s * n_inner + i, 0)),
        ],
        out_specs=pl.BlockSpec((1, 1, 3 * num_classes, 128),
                               lambda n, s, i: (n, s, 0, 0)),
        compiler_params=pltpu.CompilerParams(
            dimension_semantics=("parallel", "parallel", "arbitrary"),
            vmem_limit_bytes=32 * 1024 * 1024,
        ),
    )(logits_r, target_r)

    # Tiny glue: reduce batch/super-chunk/lane partials, then build the IoU.
    counts = counts.sum(axis=(0, 1, 3)).reshape(3, num_classes)
    inter, pcnt, tcnt = counts[0], counts[1], counts[2]
    union = pcnt + tcnt - inter
    safe_union = jnp.where(union > 0, union, 1.0)
    iou_c = jnp.where(union > 0, inter / safe_union, 0.0)   # per-class Jaccard

    if average == "macro":
        # torchmetrics macro: classes absent from both pred and target skipped.
        present = (pcnt + tcnt > 0).astype(jnp.float32)
        iou = jnp.sum(iou_c * present) / jnp.maximum(jnp.sum(present), 1.0)
        return 1.0 - iou
    elif average == "none":
        assert weight is not None, "Weight should be provided when average='none'."
        # NOTE: classes absent from both pred and target get iou_c = 0 here
        # (matching zero_division=0 behaviour).
        return jnp.mean((1.0 - iou_c) * weight)
    else:
        raise ValueError(f"unsupported average: {average}")


def _ref_iou_loss(logits, target, num_classes):
    """Pure-JAX reference mirroring torch + torchmetrics macro Jaccard."""
    probs = jax.nn.softmax(logits, axis=1)
    pred = jnp.argmax(probs, axis=1)
    ious, present = [], []
    for c in range(num_classes):
        pm = pred == c
        tm = target == c
        inter = jnp.sum(jnp.logical_and(pm, tm)).astype(jnp.float32)
        union = jnp.sum(pm).astype(jnp.float32) + jnp.sum(tm).astype(jnp.float32) - inter
        ious.append(jnp.where(union > 0, inter / jnp.where(union > 0, union, 1.0), 0.0))
        present.append((jnp.sum(pm) + jnp.sum(tm) > 0).astype(jnp.float32))
    ious = jnp.stack(ious)
    present = jnp.stack(present)
    iou = jnp.sum(ious * present) / jnp.maximum(jnp.sum(present), 1.0)
    return 1.0 - iou


if __name__ == "__main__":
    key = jax.random.PRNGKey(0)
    k_logits, k_target = jax.random.split(key)

    N, C, H, W = 2, 4, 16, 16
    logits = jax.random.normal(k_logits, (N, C, H, W), dtype=jnp.float32)
    # target holds class indices (torch int64 -> int32 on TPU)
    target = jax.random.randint(k_target, (N, H, W), 0, C, dtype=jnp.int32)

    loss = iou_loss(logits, target, num_classes=C, average="macro")
    loss = jax.block_until_ready(loss)

    ref = _ref_iou_loss(logits, target, C)
    assert abs(float(loss) - float(ref)) < 1e-5, (float(loss), float(ref))

    print("KERNEL_OK")
</pallas_src>

<mosaic_0001>
module attributes {stable_mosaic.version = 11 : i64} {
  func.func @_iou_counts_kernel(%arg0: i32, %arg1: i32, %arg2: i32, %arg3: memref<1x4x2x128xf32, #tpu.memory_space<vmem>>, %arg4: memref<1x2x128xi32, #tpu.memory_space<vmem>>, %arg5: memref<1x1x12x128xf32, #tpu.memory_space<vmem>>) attributes {dimension_semantics = [#tpu.dimension_semantics<parallel>, #tpu.dimension_semantics<parallel>, #tpu.dimension_semantics<arbitrary>], iteration_bounds = array<i64: 2, 1, 1>, scalar_prefetch = 0 : i64, scratch_operands = 0 : i64, tpu.core_type = #tpu.core_type<tc>, window_params = [{transform_indices = @transform_0, window_bounds = array<i64: 1, 4, 2, 128>}, {transform_indices = @transform_1, window_bounds = array<i64: 1, 2, 128>}, {transform_indices = @transform_2, window_bounds = array<i64: 1, 1, 12, 128>}]} {
    %c0_i32 = arith.constant 0 : i32
    %0 = arith.cmpi eq, %arg2, %c0_i32 : i32
    %1 = arith.extui %0 : i1 to i32
    %c0_i32_0 = arith.constant 0 : i32
    %2 = arith.cmpi ne, %1, %c0_i32_0 : i32
    scf.if %2 {
      %cst_38 = arith.constant 0.000000e+00 : f32
      %123 = vector.broadcast %cst_38 : f32 to vector<1x1x12x128xf32>
      %c0_39 = arith.constant 0 : index
      %c0_40 = arith.constant 0 : index
      %c0_41 = arith.constant 0 : index
      %c0_42 = arith.constant 0 : index
      %124 = vector.load %arg5[%c0_39, %c0_40, %c0_41, %c0_42] : memref<1x1x12x128xf32, #tpu.memory_space<vmem>>, vector<1x1x12x128xf32>
      tpu.vector_store %arg5[%c0_39, %c0_40, %c0_41, %c0_42], %123 {strides = array<i32>} : memref<1x1x12x128xf32, #tpu.memory_space<vmem>>, vector<1x1x12x128xf32>,
    } else {
    }
    %c1_i32 = arith.constant 1 : i32
    %3 = arith.muli %arg1, %c1_i32 : i32
    %4 = arith.addi %3, %arg2 : i32
    %c256_i32 = arith.constant 256 : i32
    %5 = arith.muli %4, %c256_i32 : i32
    %6 = tpu.iota {dimensions = array<i32: 0>} : vector<2x128xi32>
    %c128_i32 = arith.constant 128 : i32
    %7 = vector.broadcast %c128_i32 : i32 to vector<2x128xi32>
    %8 = arith.muli %6, %7 : vector<2x128xi32>
    %9 = tpu.iota {dimensions = array<i32: 1>} : vector<2x128xi32>
    %10 = arith.addi %8, %9 : vector<2x128xi32>
    %cst = arith.constant 0.000000e+00 : f32
    %11 = vector.broadcast %cst : f32 to vector<4x2x128xf32>
    %c0_i32_1 = arith.constant 0 : i32
    %c2_i32 = arith.constant 2 : i32
    %12 = arith.muli %c0_i32_1, %c2_i32 : i32
    %13 = tpu.assume_multiple %12, 2 : i32
    %c256_i32_2 = arith.constant 256 : i32
    %14 = arith.muli %c0_i32_1, %c256_i32_2 : i32
    %15 = arith.addi %5, %14 : i32
    %16 = vector.broadcast %15 : i32 to vector<2x128xi32>
    %17 = arith.addi %10, %16 : vector<2x128xi32>
    %c256_i32_3 = arith.constant 256 : i32
    %18 = vector.broadcast %c256_i32_3 : i32 to vector<2x128xi32>
    %19 = arith.cmpi slt, %17, %18 : vector<2x128xi32>
    %c0 = arith.constant 0 : index
    %20 = arith.index_cast %13 : i32 to index
    %c0_4 = arith.constant 0 : index
    %21 = vector.load %arg4[%c0, %20, %c0_4] : memref<1x2x128xi32, #tpu.memory_space<vmem>>, vector<1x2x128xi32>
    %22 = vector.shape_cast %21 : vector<1x2x128xi32> to vector<2x128xi32>
    %c4_i32 = arith.constant 4 : i32
    %23 = vector.broadcast %c4_i32 : i32 to vector<2x128xi32>
    %24 = arith.select %19, %22, %23 : vector<2x128xi1>, vector<2x128xi32>
    %c0_5 = arith.constant 0 : index
    %c0_6 = arith.constant 0 : index
    %25 = arith.index_cast %13 : i32 to index
    %c0_7 = arith.constant 0 : index
    %26 = vector.load %arg3[%c0_5, %c0_6, %25, %c0_7] : memref<1x4x2x128xf32, #tpu.memory_space<vmem>>, vector<1x1x2x128xf32>
    %27 = vector.shape_cast %26 : vector<1x1x2x128xf32> to vector<2x128xf32>
    %c0_i32_8 = arith.constant 0 : i32
    %28 = vector.broadcast %c0_i32_8 : i32 to vector<2x128xi32>
    %c0_9 = arith.constant 0 : index
    %c1 = arith.constant 1 : index
    %29 = arith.index_cast %13 : i32 to index
    %c0_10 = arith.constant 0 : index
    %30 = vector.load %arg3[%c0_9, %c1, %29, %c0_10] : memref<1x4x2x128xf32, #tpu.memory_space<vmem>>, vector<1x1x2x128xf32>
    %31 = vector.shape_cast %30 : vector<1x1x2x128xf32> to vector<2x128xf32>
    %32 = arith.cmpf ogt, %31, %27 : vector<2x128xf32>
    %33 = arith.select %32, %31, %27 : vector<2x128xi1>, vector<2x128xf32>
    %c1_i32_11 = arith.constant 1 : i32
    %34 = vector.broadcast %c1_i32_11 : i32 to vector<2x128xi32>
    %35 = arith.select %32, %34, %28 : vector<2x128xi1>, vector<2x128xi32>
    %c0_12 = arith.constant 0 : index
    %c2 = arith.constant 2 : index
    %36 = arith.index_cast %13 : i32 to index
    %c0_13 = arith.constant 0 : index
    %37 = vector.load %arg3[%c0_12, %c2, %36, %c0_13] : memref<1x4x2x128xf32, #tpu.memory_space<vmem>>, vector<1x1x2x128xf32>
    %38 = vector.shape_cast %37 : vector<1x1x2x128xf32> to vector<2x128xf32>
    %39 = arith.cmpf ogt, %38, %33 : vector<2x128xf32>
    %40 = arith.select %39, %38, %33 : vector<2x128xi1>, vector<2x128xf32>
    %c2_i32_14 = arith.constant 2 : i32
    %41 = vector.broadcast %c2_i32_14 : i32 to vector<2x128xi32>
    %42 = arith.select %39, %41, %35 : vector<2x128xi1>, vector<2x128xi32>
    %c0_15 = arith.constant 0 : index
    %c3 = arith.constant 3 : index
    %43 = arith.index_cast %13 : i32 to index
    %c0_16 = arith.constant 0 : index
    %44 = vector.load %arg3[%c0_15, %c3, %43, %c0_16] : memref<1x4x2x128xf32, #tpu.memory_space<vmem>>, vector<1x1x2x128xf32>
    %45 = vector.shape_cast %44 : vector<1x1x2x128xf32> to vector<2x128xf32>
    %46 = arith.cmpf ogt, %45, %40 : vector<2x128xf32>
    %c3_i32 = arith.constant 3 : i32
    %47 = vector.broadcast %c3_i32 : i32 to vector<2x128xi32>
    %48 = arith.select %46, %47, %42 : vector<2x128xi1>, vector<2x128xi32>
    %c4_i32_17 = arith.constant 4 : i32
    %49 = vector.broadcast %c4_i32_17 : i32 to vector<2x128xi32>
    %50 = arith.select %19, %48, %49 : vector<2x128xi1>, vector<2x128xi32>
    %c0_i32_18 = arith.constant 0 : i32
    %51 = vector.broadcast %c0_i32_18 : i32 to vector<2x128xi32>
    %52 = arith.cmpi eq, %50, %51 : vector<2x128xi32>
    %c1_i32_19 = arith.constant 1 : i32
    %53 = vector.broadcast %c1_i32_19 : i32 to vector<2x128xi32>
    %54 = arith.cmpi eq, %50, %53 : vector<2x128xi32>
    %c2_i32_20 = arith.constant 2 : i32
    %55 = vector.broadcast %c2_i32_20 : i32 to vector<2x128xi32>
    %56 = arith.cmpi eq, %50, %55 : vector<2x128xi32>
    %c3_i32_21 = arith.constant 3 : i32
    %57 = vector.broadcast %c3_i32_21 : i32 to vector<2x128xi32>
    %58 = arith.cmpi eq, %50, %57 : vector<2x128xi32>
    %c0_i32_22 = arith.constant 0 : i32
    %59 = vector.broadcast %c0_i32_22 : i32 to vector<2x128xi32>
    %60 = arith.cmpi eq, %24, %59 : vector<2x128xi32>
    %c1_i32_23 = arith.constant 1 : i32
    %61 = vector.broadcast %c1_i32_23 : i32 to vector<2x128xi32>
    %62 = arith.cmpi eq, %24, %61 : vector<2x128xi32>
    %c2_i32_24 = arith.constant 2 : i32
    %63 = vector.broadcast %c2_i32_24 : i32 to vector<2x128xi32>
    %64 = arith.cmpi eq, %24, %63 : vector<2x128xi32>
    %c3_i32_25 = arith.constant 3 : i32
    %65 = vector.broadcast %c3_i32_25 : i32 to vector<2x128xi32>
    %66 = arith.cmpi eq, %24, %65 : vector<2x128xi32>
    %67 = arith.andi %52, %60 : vector<2x128xi1>
    %68 = arith.extui %67 : vector<2x128xi1> to vector<2x128xi32>
    %69 = arith.sitofp %68 : vector<2x128xi32> to vector<2x128xf32>
    %70 = arith.andi %54, %62 : vector<2x128xi1>
    %71 = arith.extui %70 : vector<2x128xi1> to vector<2x128xi32>
    %72 = arith.sitofp %71 : vector<2x128xi32> to vector<2x128xf32>
    %73 = arith.andi %56, %64 : vector<2x128xi1>
    %74 = arith.extui %73 : vector<2x128xi1> to vector<2x128xi32>
    %75 = arith.sitofp %74 : vector<2x128xi32> to vector<2x128xf32>
    %76 = arith.andi %58, %66 : vector<2x128xi1>
    %77 = arith.extui %76 : vector<2x128xi1> to vector<2x128xi32>
    %78 = arith.sitofp %77 : vector<2x128xi32> to vector<2x128xf32>
    %79 = vector.shape_cast %69 : vector<2x128xf32> to vector<1x2x128xf32>
    %80 = vector.shape_cast %72 : vector<2x128xf32> to vector<1x2x128xf32>
    %81 = vector.shape_cast %75 : vector<2x128xf32> to vector<1x2x128xf32>
    %82 = vector.shape_cast %78 : vector<2x128xf32> to vector<1x2x128xf32>
    %83 = tpu.concatenate %79, %80, %81, %82 in 0 : vector<1x2x128xf32>, vector<1x2x128xf32>, vector<1x2x128xf32>, vector<1x2x128xf32> -> vector<4x2x128xf32>
    %84 = arith.extui %52 : vector<2x128xi1> to vector<2x128xi32>
    %85 = arith.sitofp %84 : vector<2x128xi32> to vector<2x128xf32>
    %86 = arith.extui %54 : vector<2x128xi1> to vector<2x128xi32>
    %87 = arith.sitofp %86 : vector<2x128xi32> to vector<2x128xf32>
    %88 = arith.extui %56 : vector<2x128xi1> to vector<2x128xi32>
    %89 = arith.sitofp %88 : vector<2x128xi32> to vector<2x128xf32>
    %90 = arith.extui %58 : vector<2x128xi1> to vector<2x128xi32>
    %91 = arith.sitofp %90 : vector<2x128xi32> to vector<2x128xf32>
    %92 = vector.shape_cast %85 : vector<2x128xf32> to vector<1x2x128xf32>
    %93 = vector.shape_cast %87 : vector<2x128xf32> to vector<1x2x128xf32>
    %94 = vector.shape_cast %89 : vector<2x128xf32> to vector<1x2x128xf32>
    %95 = vector.shape_cast %91 : vector<2x128xf32> to vector<1x2x128xf32>
    %96 = tpu.concatenate %92, %93, %94, %95 in 0 : vector<1x2x128xf32>, vector<1x2x128xf32>, vector<1x2x128xf32>, vector<1x2x128xf32> -> vector<4x2x128xf32>
    %97 = arith.extui %60 : vector<2x128xi1> to vector<2x128xi32>
    %98 = arith.sitofp %97 : vector<2x128xi32> to vector<2x128xf32>
    %99 = arith.extui %62 : vector<2x128xi1> to vector<2x128xi32>
    %100 = arith.sitofp %99 : vector<2x128xi32> to vector<2x128xf32>
    %101 = arith.extui %64 : vector<2x128xi1> to vector<2x128xi32>
    %102 = arith.sitofp %101 : vector<2x128xi32> to vector<2x128xf32>
    %103 = arith.extui %66 : vector<2x128xi1> to vector<2x128xi32>
    %104 = arith.sitofp %103 : vector<2x128xi32> to vector<2x128xf32>
    %105 = vector.shape_cast %98 : vector<2x128xf32> to vector<1x2x128xf32>
    %106 = vector.shape_cast %100 : vector<2x128xf32> to vector<1x2x128xf32>
    %107 = vector.shape_cast %102 : vector<2x128xf32> to vector<1x2x128xf32>
    %108 = vector.shape_cast %104 : vector<2x128xf32> to vector<1x2x128xf32>
    %109 = tpu.concatenate %105, %106, %107, %108 in 0 : vector<1x2x128xf32>, vector<1x2x128xf32>, vector<1x2x128xf32>, vector<1x2x128xf32> -> vector<4x2x128xf32>
    %110 = arith.addf %11, %83 : vector<4x2x128xf32>
    %111 = arith.addf %11, %96 : vector<4x2x128xf32>
    %112 = arith.addf %11, %109 : vector<4x2x128xf32>
    %c1_i32_26 = arith.constant 1 : i32
    %cst_27 = arith.constant dense<0.000000e+00> : vector<4x128xf32>
    %113 = vector.multi_reduction <add>, %110, %cst_27 [1] : vector<4x2x128xf32> to vector<4x128xf32>
    %cst_28 = arith.constant dense<0.000000e+00> : vector<4x128xf32>
    %114 = vector.multi_reduction <add>, %111, %cst_28 [1] : vector<4x2x128xf32> to vector<4x128xf32>
    %cst_29 = arith.constant dense<0.000000e+00> : vector<4x128xf32>
    %115 = vector.multi_reduction <add>, %112, %cst_29 [1] : vector<4x2x128xf32> to vector<4x128xf32>
    %116 = tpu.concatenate %113, %114, %115 in 0 : vector<4x128xf32>, vector<4x128xf32>, vector<4x128xf32> -> vector<12x128xf32>
    %c0_30 = arith.constant 0 : index
    %c0_31 = arith.constant 0 : index
    %c0_32 = arith.constant 0 : index
    %c0_33 = arith.constant 0 : index
    %117 = vector.load %arg5[%c0_30, %c0_31, %c0_32, %c0_33] : memref<1x1x12x128xf32, #tpu.memory_space<vmem>>, vector<1x1x12x128xf32>
    %118 = vector.shape_cast %117 : vector<1x1x12x128xf32> to vector<12x128xf32>
    %119 = arith.addf %118, %116 : vector<12x128xf32>
    %c0_34 = arith.constant 0 : index
    %c0_35 = arith.constant 0 : index
    %c0_36 = arith.constant 0 : index
    %c0_37 = arith.constant 0 : index
    %120 = vector.load %arg5[%c0_34, %c0_35, %c0_36, %c0_37] : memref<1x1x12x128xf32, #tpu.memory_space<vmem>>, vector<1x1x12x128xf32>
    %121 = vector.shape_cast %120 : vector<1x1x12x128xf32> to vector<12x128xf32>
    %122 = vector.shape_cast %119 : vector<12x128xf32> to vector<1x1x12x128xf32>
    tpu.vector_store %arg5[%c0_34, %c0_35, %c0_36, %c0_37], %122 {strides = array<i32>} : memref<1x1x12x128xf32, #tpu.memory_space<vmem>>, vector<1x1x12x128xf32>,
    return
  }
  func.func @transform_0(%arg0: i32, %arg1: i32, %arg2: i32) -> (i32, i32, i32, i32) {
    %c1_i32 = arith.constant 1 : i32
    %0 = arith.muli %arg1, %c1_i32 : i32
    %1 = arith.addi %0, %arg2 : i32
    %c0_i32 = arith.constant 0 : i32
    %c0_i32_0 = arith.constant 0 : i32
    %c0_i32_1 = arith.constant 0 : i32
    return %arg0, %c0_i32, %1, %c0_i32_0 : i32, i32, i32, i32
  }
  func.func @transform_1(%arg0: i32, %arg1: i32, %arg2: i32) -> (i32, i32, i32) {
    %c1_i32 = arith.constant 1 : i32
    %0 = arith.muli %arg1, %c1_i32 : i32
    %1 = arith.addi %0, %arg2 : i32
    %c0_i32 = arith.constant 0 : i32
    %c0_i32_0 = arith.constant 0 : i32
    return %arg0, %1, %c0_i32 : i32, i32, i32
  }
  func.func @transform_2(%arg0: i32, %arg1: i32, %arg2: i32) -> (i32, i32, i32, i32) {
    %c0_i32 = arith.constant 0 : i32
    %c0_i32_0 = arith.constant 0 : i32
    %c0_i32_1 = arith.constant 0 : i32
    return %arg0, %arg1, %c0_i32, %c0_i32_0 : i32, i32, i32, i32
  }
}

</mosaic_0001>

<bundles_post_ra>
// kernel: tpu_custom_call.1
= control target key start
LH: loop header
LB: loop body
LE: loop exit
PB: predicated region body
PF: predicated region fallthrough
CT: control target
= control target key end

     0   :  { %7 = vsyncpa [#allocation3], 0  ;;  %s1041_s0 = inlined_call_operand.hbm [shape: f32[2,4,2,128], index: 0, kind: input, shape index: {}]   ;;  %s1042_s1 = inlined_call_operand.hbm [shape: s32[2,2,128], index: 1, kind: input, shape index: {}]   ;;  %s1043_s2 = inlined_call_operand.vmem [shape: f32[2,1,12,128], index: 2, kind: output, shape index: {}]  }
   0x1   :  { %9 = vsyncpa [#allocation3 + $0x1], 0 }
   0x2   :  { %10 = vsyncpa [#allocation5], 0 }
   0x3   :  { %12 = vsyncpa [#allocation5 + $0x1], 0  ;;  %s816_s9 = smov 0   ;;  %s818_s10 = smov 0  }
   0x4   :  { %s820_s11 = smov 0   ;;  %s822_s12 = smov 0  }
   0x5   :  { %s824_s13 = smov 0   ;;  %s826_s14 = smov 0  }
   0x6 LB: > { %s582_s15 = sadd.s32 4294967295, %s793_s14   ;;  %s37_s16 = sadd.s32 1, %s789_s13  ;;  %s793_s14 = sphi %s826_s14, %s18_s14   ;;  %s789_s13 = sphi %s824_s13, %s1055_s13   ;;  %s785_s12 = sphi %s822_s12, %s1054_s12   ;;  %s781_s11 = sphi %s820_s11, %s1053_s11   ;;  %s777_s10 = sphi %s818_s10, %s1052_s10   ;;  %s773_s9 = sphi %s816_s9, %s1051_s9  }
   0x7   : > { %p39_p0 = scmp.ge.s32.totalorder %s37_s16, 2  ;;  %s48_s17 = sadd.s32 1, %s781_s11 }
   0x8   : > { %p55_p1 = scmp.ne.s32.totalorder %s781_s11, %s777_s10  ;;  %p56_p2 = scmp.eq.s32.totalorder %s793_s14, 0 }
   0x9   : > { %s1057_s16 = smov (%p39_p0, %s37_s16), 0  ;;  %p61_p4 = scmp.ne.s32.totalorder %s777_s10, %s773_s9 }
   0xa   : > { %p852_p3 = por %p56_p2, %p55_p1  ;;  %s43_s19 = ssub.s32 %s789_s13, %s1057_s16 }
   0xb   : > { %p62_p5 = scmp.eq.s32.totalorder %s582_s15, 0  ;;  %p46_p6 = scmp.eq.s32.totalorder %s43_s19, 0 }
   0xc   : > { %p626_p8 = scmp.lt.s32.totalorder %s793_s14, 2  ;;  %s868_s22 = sand.u32 1, %s781_s11  }
   0xd   : > { %p859_p7 = por %p62_p5, %p61_p4  ;;  %s613_s23 = sshll.u32 %s789_s13, 7 }
   0xe   : > { %s865_s21 = scalar_select %p46_p6, %s781_s11, %s48_s17  }
   0xf   : > { %s1046_s20 = scalar_select %p859_p7, 1, 0 }
  0x10   : > { %s586_s24 = sshll.u32 %s868_s22, 3  ;;  %s875_s27 = scalar_lea.hbm %s1041_s0, %s613_s23 }
  0x11   : > { %s147_s28 = scalar_lea.vmem [#allocation2], %s586_s24  ;;  %p879_p9 = pnand %p626_p8, %p852_p3 }
  0x12   : > { %s156_s29 = sshll.u32 %s147_s28, 4  ;;  %s144_s3 = scalar_lea.sflag [#allocation3], %s868_s22  ;;  %s883_s29 = int_to_ptr.vmem [resolvable:$true] %s156_s29 }
  0x13   : > { %s679_s4 = scalar_lea.hbm %s875_s27, 128  ;;  %p681_p11 = pneg %p879_p9 }
  0x14   : > { %p680_p10 = scmp.ne.s32.totalorder %s875_s27, %s679_s4  ;;  %s684_s7 = scalar_lea.hbm %s1041_s0, 256 }
  0x15   : > { %p685_p0 = scmp.lt.u32.totalorder %s875_s27, %s1041_s0  ;;  %p686_p1 = scmp.lt.u32.totalorder %s684_s7, %s679_s4 }
  0x16   : > { %p682_p12 = pnand %p681_p11, %p680_p10  ;;  %p688_p3 = scmp.lt.u32.totalorder %s679_s4, %s875_s27 }
  0x17   : > { %p687_p2 = por %p686_p1, %p685_p0 }
  0x18   : > { %p683_p13 = pneg %p682_p12 }
  0x19   : > { %p689_p4 = por %p688_p3, %p687_p2 }
  0x1b   : > { %p690_p5 = pnand %p689_p4, %p683_p13 }
  0x1d   : > { %693 = shalt.err (!%p690_p5)
}
  0x1e   : > { %s694_s15 = scalar_lea.vmem %s883_s29, 128  ;;  %s795_s17 = smov [#allocation2]  }
  0x1f   : > { %p695_p6 = scmp.ne.s32.totalorder %s883_s29, %s694_s15  ;;  %s699_s18 = sshll.u32 %s795_s17, 4  ;;  %s700_s18 = int_to_ptr.vmem [resolvable:$false] %s699_s18 }
  0x20   : > { %s701_s19 = scalar_lea.vmem %s700_s18, 256  ;;  %p702_p12 = scmp.lt.s32.totalorder %s883_s29, %s700_s18 }
  0x21   : > { %p697_p8 = pnand %p695_p6, %p681_p11  ;;  %p703_p0 = scmp.lt.s32.totalorder %s701_s19, %s694_s15 }
  0x23   : > { %p698_p10 = pneg %p697_p8  ;;  %p704_p1 = por %p703_p0, %p702_p12 }
  0x25   : > { %p705_p2 = pnand %p704_p1, %p698_p10 }
  0x27   : > { %708 = shalt.err (!%p705_p2)
}
  0x28   : > { %s796_s23 = smov 32   ;;  %s797_s24 = smov 2  }
  0x29   : > { %622 = dma.hbm_to_vmem [thread:$0]  (!%p879_p9), %s875_s27, 128, %s883_s29, %s144_s3, %s796_s23, %s796_s23, %s797_s24  }
  0x2a   : > { %p591_p13 = scmp.ge.s32.totalorder %s793_s14, 1  ;;  %p184_p3 = scmp.lt.s32.totalorder %s793_s14, 3 }
  0x2b   : > { %s589_s25 = sshll.u32 %s868_s22, 1  ;;  %s590_s28 = sshll.u32 %s789_s13, 5 }
  0x2c   : > { %p916_p4 = pnand %p591_p13, %p184_p3  ;;  %s170_s4 = scalar_lea.vmem [#allocation4], %s589_s25 }
  0x2d   : > { %s179_s5 = sshll.u32 %s170_s4, 4  ;;  %s924_s8 = scalar_lea.hbm %s1042_s1, %s590_s28  ;;  %s180_s5 = int_to_ptr.vmem [resolvable:$true] %s179_s5 }
  0x2e   : > { %s1048_s26 = scalar_select %p916_p4, 1, 0 }
  0x2f   : > { %s167_s27 = scalar_lea.sflag [#allocation5], %s868_s22  ;;  %s709_s29 = scalar_lea.hbm %s924_s8, 32 }
  0x30   : > { %p710_p5 = scmp.ne.s32.totalorder %s924_s8, %s709_s29  ;;  %s714_s15 = scalar_lea.hbm %s1042_s1, 64 }
  0x31   : > { %p715_p10 = scmp.lt.u32.totalorder %s924_s8, %s1042_s1  ;;  %p716_p12 = scmp.lt.u32.totalorder %s714_s15, %s709_s29 }
  0x32   : > { %p712_p6 = pnand %p710_p5, %p681_p11  ;;  %p718_p1 = scmp.lt.u32.totalorder %s709_s29, %s924_s8 }
  0x33   : > { %p717_p0 = por %p716_p12, %p715_p10 }
  0x34   : > { %p713_p8 = pneg %p712_p6 }
  0x35   : > { %p719_p2 = por %p718_p1, %p717_p0 }
  0x37   : > { %p720_p13 = pnand %p719_p2, %p713_p8 }
  0x39   : > { %723 = shalt.err (!%p720_p13)
}
  0x3a   : > { %s724_s22 = scalar_lea.vmem %s180_s5, 32  ;;  %s798_s19 = smov [#allocation4]  }
  0x3b   : > { %p725_p3 = scmp.ne.s32.totalorder %s180_s5, %s724_s22  ;;  %s729_s23 = sshll.u32 %s798_s19, 4  ;;  %s730_s23 = int_to_ptr.vmem [resolvable:$false] %s729_s23 }
  0x3c   : > { %s731_s24 = scalar_lea.vmem %s730_s23, 64  ;;  %p732_p7 = scmp.lt.s32.totalorder %s180_s5, %s730_s23 }
  0x3d   : > { %p727_p5 = pnand %p725_p3, %p681_p11  ;;  %p733_p4 = scmp.lt.s32.totalorder %s731_s24, %s724_s22 }
  0x3f   : > { %p728_p6 = pneg %p727_p5  ;;  %p734_p10 = por %p733_p4, %p732_p7 }
  0x41   : > { %p735_p12 = pnand %p734_p10, %p728_p6 }
  0x43   : > { %738 = shalt.err (!%p735_p12)
}
  0x44   : > { %625 = dma.hbm_to_vmem [thread:$0]  (!%p879_p9), %s924_s8, 32, %s180_s5, %s167_s27  }
  0x45   : > { %p1049_p8 = scmp.ne.s32.totalorder %s1048_s26, 0 }
  0x46   : > { %s190_s25 = sand.u32 (!%p1049_p8), 1, %s777_s10   ;;  %p1050_p11 = scmp.ne.s32.totalorder (!%p1049_p8), %s1046_s20, 0 }
  0x47   : > { %188 = sbr.rel (%p1049_p8) target bundleno = 133 (0x85), region = 28  ;;  %s592_s28 = sshll.u32 (!%p1049_p8), %s190_s25, 3 }
  0x48   : > { %s191_s4 = scalar_lea.sflag (!%p1049_p8), [#allocation3], %s190_s25  ;;  %s194_s6 = scalar_lea.vmem (!%p1049_p8), [#allocation2], %s592_s28 }
  0x4e   : > { %764 = dma.done.wait (%p1050_p11), %s191_s4, 128  }
  0x4f   : > { %766 = vsyncadd (%p1050_p11), %s191_s4, 4294967168  ;;  %s593_s7 = sshll.u32 %s190_s25, 1  ;;  %s200_s29 = scalar_lea.sflag [#allocation5], %s190_s25 }
  0x50   : > { %s203_s30 = scalar_lea.vmem [#allocation4], %s593_s7 }
  0x51   : > { %768 = dma.done.wait (%p1050_p11), %s200_s29, 32  }
  0x52   : > { %770 = vsyncadd (%p1050_p11), %s200_s29, 4294967264  ;;  %p235_p7 = scmp.lt.s32.totalorder %s785_s12, 1  ;;  %v252_v0 = vlaneseq  ;;  %v799_v4 = vmov 0.0   ;;  %v261_v6 = vld [vmem:[%s203_s30] sm:$0x3]  ;;  %v800_v12 = vmov 0  }
  0x53   : > { %v263_v7 = vld [vmem:[%s194_s6] sm:$0x3]  ;;  %v596_v8 = vld [vmem:[%s194_s6 + $0x2] sm:$0x3]  ;;  %v597_v9 = vld [vmem:[%s194_s6 + $0x4] sm:$0x3] }
  0x54   : > { %s1059_s12 = smov (!%p235_p7, %s785_s12), 1  ;;  %v253_v1 = vshrl.u32 %v252_v0, 7  ;;  %v256_v2 = vand.u32 127, %v252_v0  ;;  %vm267_vm1 = vcmp.gt.f32.partialorder %v596_v8, %v263_v7  ;;  %v598_v14 = vld [vmem:[%s194_s6 + $0x6] sm:$0x3]  ;;  %vm330_vm2 = vcmask 1041408  }
  0x55   : > { %s614_s26 = sshll.u32 %s1059_s12, 4  ;;  %v268_v11 = vsel %vm267_vm1, %v596_v8, %v263_v7  ;;  %v269_v13 = vsel %vm267_vm1, 1, %v800_v12  ;;  %vm430_vm1 = vcmask 1045509  }
  0x56   : > { %v254_v3 = vmul.u32 128, %v253_v1  ;;  %s962_s27 = scalar_lea.vmem %s1043_s2, %s614_s26  ;;  %vm273_vm3 = vcmp.gt.f32.partialorder %v597_v9, %v268_v11 }
  0x57   : > { %249 = vst [vmem:[%s962_s27 + $0x8] sm:$0xf] %v799_v4  ;;  %v274_v15 = vsel %vm273_vm3, %v597_v9, %v268_v11  ;;  %v275_v16 = vsel %vm273_vm3, 2, %v269_v13  ;;  %vm419_vm3 = vcmask 1041409  }
  0x58   : > { %v257_v5 = vadd.s32 %v256_v2, %v254_v3  ;;  %vm279_vm8 = vcmp.gt.f32.partialorder %v598_v14, %v274_v15 }
  0x59   : > { %v280_v21 = vsel %vm279_vm8, 3, %v275_v16  ;;  %vm445_vm8 = vcmask 1043456  }
  0x5a   : > { %vm260_vm0 = vcmp.lt.s32.totalorder %v257_v5, 256 }
  0x5b   : > { %v262_v10 = vsel %vm260_vm0, %v261_v6, 4  ;;  %v281_v25 = vsel %vm260_vm0, %v280_v21, 4 }
  0x5c   : > { %vm286_vm4 = vcmp.eq.s32.totalorder %v262_v10, 0  ;;  %vm287_vm5 = vcmp.eq.s32.totalorder %v262_v10, 1  ;;  %vm288_vm6 = vcmp.eq.s32.totalorder %v262_v10, 2  ;;  %vm289_vm7 = vcmp.eq.s32.totalorder %v262_v10, 3 }
  0x5d   : > { %v607_v17 = vsel %vm286_vm4, 1.0, %v799_v4  ;;  %v608_v18 = vsel %vm287_vm5, 1.0, %v799_v4  ;;  %v609_v19 = vsel %vm288_vm6, 1.0, %v799_v4  ;;  %v970_v20 = vsel %vm289_vm7, 1.0, %v799_v4 }
  0x5e   : > { %v973_v22 = vsel %vm330_vm2, %v607_v17, 0.0  ;;  %v976_v23 = vsel %vm330_vm2, %v608_v18, 0.0  ;;  %v979_v24 = vsel %vm330_vm2, %v609_v19, 0.0  ;;  %vm282_vm9 = vcmp.eq.s32.totalorder %v281_v25, 0 }
  0x5f   : > { %v388_v26 = vrot.slane %v973_v22, 4  ;;  %v395_v27 = vrot.slane %v976_v23, 4  ;;  %v402_v28 = vrot.slane %v979_v24, 4  ;;  %vm283_vm10 = vcmp.eq.s32.totalorder %v281_v25, 1  ;;  %vm290_vm13 = vmand %vm282_vm9, %vm286_vm4 }
  0x60   : > { %vm284_vm11 = vcmp.eq.s32.totalorder %v281_v25, 2  ;;  %vm285_vm12 = vcmp.eq.s32.totalorder %v281_v25, 3  ;;  %v603_v29 = vsel %vm282_vm9, 1.0, %v799_v4  ;;  %v604_v30 = vsel %vm283_vm10, 1.0, %v799_v4  ;;  %vm293_vm14 = vmand %vm283_vm10, %vm287_vm5 }
  0x61   : > { %v605_v31 = vsel %vm284_vm11, 1.0, %v799_v4  ;;  %v606_v32 = vsel %vm285_vm12, 1.0, %v799_v4  ;;  %v599_v33 = vsel %vm290_vm13, 1.0, %v799_v4  ;;  %v359_v34 = vsel %vm330_vm2, %v603_v29, 0.0  ;;  %vm296_vm15 = vmand %vm284_vm11, %vm288_vm6 }
  0x62   : > { %v366_v35 = vsel %vm330_vm2, %v604_v30, 0.0  ;;  %v373_v36 = vsel %vm330_vm2, %v605_v31, 0.0  ;;  %v600_v37 = vsel %vm293_vm14, 1.0, %v799_v4  ;;  %v331_v38 = vsel %vm330_vm2, %v599_v33, 0.0  ;;  %vm299_vm0 = vmand %vm285_vm12, %vm289_vm7 }
  0x63   : > { %v360_v39 = vrot.slane %v359_v34, 4  ;;  %v367_v40 = vrot.slane %v366_v35, 4  ;;  %v601_v41 = vsel %vm296_vm15, 1.0, %v799_v4  ;;  %v332_v42 = vrot.slane %v331_v38, 4 }
  0x64   : > { %v338_v43 = vsel %vm330_vm2, %v600_v37, 0.0  ;;  %v374_v44 = vrot.slane %v373_v36, 4  ;;  %v602_v45 = vsel %vm299_vm0, 1.0, %v799_v4  ;;  %v345_v47 = vsel %vm330_vm2, %v601_v41, 0.0 }
  0x65   : > { %v339_v46 = vrot.slane %v338_v43, 4  ;;  %v361_v48 = vadd.f32 %v360_v39, %v359_v34  ;;  %v333_v49 = vadd.f32 %v332_v42, %v331_v38  ;;  %v346_v50 = vrot.slane %v345_v47, 4 }
  0x66   : > { %v352_v51 = vsel %vm330_vm2, %v602_v45, 0.0  ;;  %v368_v52 = vadd.f32 %v367_v40, %v366_v35  ;;  %v375_v56 = vadd.f32 %v374_v44, %v373_v36  ;;  %vm421_vm4 = vcmask 1042434  }
  0x67   : > { %v340_v53 = vadd.f32 %v339_v46, %v338_v43  ;;  %v353_v54 = vrot.slane %v352_v51, 4  ;;  %v362_v55 = vrot.slane %v361_v48, 2  ;;  %v334_v57 = vrot.slane %v333_v49, 2 }
  0x68   : > { %v347_v58 = vadd.f32 %v346_v50, %v345_v47  ;;  %v369_v59 = vrot.slane %v368_v52, 2  ;;  %v380_v60 = vsel %vm330_vm2, %v606_v32, 0.0  ;;  %vm423_vm5 = vcmask 1043459  }
  0x69   : > { %vm432_vm6 = vcmask 1046534   ;;  %v341_v61 = vrot.slane %v340_v53, 2  ;;  %v354_v62 = vadd.f32 %v353_v54, %v352_v51  ;;  %v363_v63 = vadd.f32 %v362_v55, %v361_v48 }
  0x6a   : > { %v376_v0 = vrot.slane %v375_v56, 2  ;;  %v335_v1 = vadd.f32 %v334_v57, %v333_v49  ;;  %v348_v2 = vrot.slane %v347_v58, 2  ;;  %v370_v3 = vadd.f32 %v369_v59, %v368_v52 }
  0x6b   : > { %v381_v4 = vrot.slane %v380_v60, 4  ;;  %v342_v5 = vadd.f32 %v341_v61, %v340_v53  ;;  %v355_v6 = vrot.slane %v354_v62, 2  ;;  %v364_v7 = vrot.slane %v363_v63, 1 }
  0x6c   : > { %v377_v8 = vadd.f32 %v376_v0, %v375_v56  ;;  %vm434_vm7 = vcmask 1047559   ;;  %v336_v9 = vrot.slane %v335_v1, 1  ;;  %v349_v10 = vadd.f32 %v348_v2, %v347_v58 }
  0x6d   : > { %v371_v11 = vrot.slane %v370_v3, 1  ;;  %v382_v12 = vadd.f32 %v381_v4, %v380_v60  ;;  %v343_v13 = vrot.slane %v342_v5, 1  ;;  %v356_v14 = vadd.f32 %v355_v6, %v354_v62  ;;  %v448_v60 = vld [vmem:[%s962_s27 + $0x8] sm:$0xf] }
  0x6e   : > { %v365_v15 = vadd.f32 %v364_v7, %v363_v63  ;;  %v378_v16 = vrot.slane %v377_v8, 1  ;;  %v337_v17 = vadd.f32 %v336_v9, %v335_v1  ;;  %v350_v18 = vrot.slane %v349_v10, 1 }
  0x6f   : > { %v372_v19 = vadd.f32 %v371_v11, %v370_v3  ;;  %v383_v21 = vrot.slane %v382_v12, 2  ;;  %v344_v25 = vadd.f32 %v343_v13, %v342_v5  ;;  %v357_v29 = vrot.slane %v356_v14, 1 }
  0x70   : > { %v379_v30 = vadd.f32 %v378_v16, %v377_v8  ;;  %v389_v31 = vadd.f32 %v388_v26, %v973_v22  ;;  %v351_v32 = vadd.f32 %v350_v18, %v349_v10  ;;  %v396_v35 = vadd.f32 %v395_v27, %v976_v23 }
  0x71   : > { %v384_v33 = vadd.f32 %v383_v21, %v382_v12  ;;  %v431_v34 = vsel %vm430_vm1, %v372_v19, %v365_v15  ;;  %v358_v36 = vadd.f32 %v357_v29, %v356_v14  ;;  %v420_v37 = vsel %vm419_vm3, %v344_v25, %v337_v17 }
  0x72   : > { %v390_v38 = vrot.slane %v389_v31, 2  ;;  %v422_v40 = vsel %vm421_vm4, %v351_v32, %v420_v37  ;;  %v397_v41 = vrot.slane %v396_v35, 2  ;;  %v403_v22 = vadd.f32 %v402_v28, %v979_v24 }
  0x73   : > { %v385_v39 = vrot.slane %v384_v33, 1  ;;  %v424_v26 = vsel %vm423_vm5, %v358_v36, %v422_v40  ;;  %v433_v42 = vsel %vm432_vm6, %v379_v30, %v431_v34  ;;  %v408_v23 = vsel %vm330_vm2, %v970_v20, 0.0 }
  0x74   : > { %v391_v43 = vadd.f32 %v390_v38, %v389_v31  ;;  %v398_v44 = vadd.f32 %v397_v41, %v396_v35  ;;  %v404_v45 = vrot.slane %v403_v22, 2  ;;  %v409_v46 = vrot.slane %v408_v23, 4 }
  0x75   : > { %v386_v27 = vadd.f32 %v385_v39, %v384_v33 }
  0x76   : > { %v392_v47 = vrot.slane %v391_v43, 1  ;;  %v399_v49 = vrot.slane %v398_v44, 1  ;;  %v405_v50 = vadd.f32 %v404_v45, %v403_v22  ;;  %v410_v24 = vadd.f32 %v409_v46, %v408_v23 }
  0x77   : > { %v435_v48 = vsel %vm434_vm7, %v386_v27, %v433_v42 }
  0x78   : > { %v446_v28 = vsel %vm445_vm8, %v424_v26, %v435_v48  ;;  %v393_v51 = vadd.f32 %v392_v47, %v391_v43  ;;  %v400_v52 = vadd.f32 %v399_v49, %v398_v44  ;;  %v406_v53 = vrot.slane %v405_v50, 1 }
  0x79   : > { %v411_v54 = vrot.slane %v410_v24, 2  ;;  %451 = vst [vmem:[%s962_s27] sm:$0xff] %v446_v28 }
  0x7a   : > { %v407_v20 = vadd.f32 %v406_v53, %v405_v50  ;;  %v441_v56 = vsel %vm419_vm3, %v400_v52, %v393_v51 }
  0x7b   : > { %v412_v55 = vadd.f32 %v411_v54, %v410_v24 }
  0x7c   : > { %v442_v58 = vsel %vm421_vm4, %v407_v20, %v441_v56 }
  0x7d   : > { %v413_v57 = vrot.slane %v412_v55, 1 }
  0x7f   : > { %v414_v59 = vadd.f32 %v413_v57, %v412_v55 }
  0x81   : > { %v443_v61 = vsel %vm423_vm5, %v414_v59, %v442_v58 }
  0x82   : > { %v450_v62 = vadd.f32 %v448_v60, %v443_v61 }
  0x84   : > { %452 = vst [vmem:[%s962_s27 + $0x8] sm:$0xf] %v450_v62 }
  0x85 PF: > { %s18_s14 = sadd.s32 1, %s793_s14   ;;  %s1051_s9 = smov %s777_s10 }
  0x86   : > { %p15_p9 = scmp.ge.s32.totalorder %s18_s14, 4   ;;  %s1052_s10 = smov %s781_s11 }
  0x87   : > { %s1053_s11 = smov %s865_s21  ;;  %s1054_s12 = smov %s789_s13 }
  0x88   : > { %s1055_s13 = smov %s1057_s16  ;;  %17 = sbr.rel (!%p15_p9) target bundleno = 6 (0x6), region = 88 }
  0x8f   :  { %482 = vsyncpa [#allocation3], 1 }
  0x90   :  { %484 = vsyncpa [#allocation3 + $0x1], 1 }
  0x91   :  { %485 = vsyncpa [#allocation5], 1 }
  0x92   :  { %487 = vsyncpa [#allocation5 + $0x1], 1 }

</bundles_post_ra>
